<compile_context>
chip_gen: v7x
topology: tpu7x:2x2x1
jax: 0.10.0
libtpu: 0.0.40
codegen_flags: <defaults>
</compile_context>

<pallas_src>
import math
import functools
import numpy as np
import jax
import jax.numpy as jnp
from jax.experimental import pallas as pl
from jax.experimental.pallas import tpu as pltpu


# ---------------------------------------------------------------------------
# Rotation operator construction (parameter-setup glue, plain numpy, cached).
# Dense re-implementation of rotation.MultiRotationOperatorMatrixSparse:
# bilinear inverse-map rotation of a KxK stencil about its center, stacked
# over theta_i = i * periodicity / orientations_nb, with a circular disk mask.
# TODO(synk): the original se2cnn `rotation` module source was not provided;
# rotation sign / mask-radius conventions here are the standard ones.
# ---------------------------------------------------------------------------
def _rotation_operator_matrix(ksize, theta, disk_mask=True):
    n = ksize
    c = (n - 1) / 2.0
    mat = np.zeros((n * n, n * n), dtype=np.float32)
    ct, st = np.cos(theta), np.sin(theta)
    for i in range(n):          # output row
        for j in range(n):      # output col
            y = i - c
            x = j - c
            if disk_mask and (x * x + y * y) > (c + 0.5) ** 2:
                continue
            # inverse rotation -> source coordinates in the un-rotated kernel
            xs = ct * x + st * y
            ys = -st * x + ct * y
            xf, yf = xs + c, ys + c
            i0, j0 = int(np.floor(yf)), int(np.floor(xf))
            di, dj = yf - i0, xf - j0
            for ii, jj, w in ((i0, j0, (1 - di) * (1 - dj)),
                              (i0, j0 + 1, (1 - di) * dj),
                              (i0 + 1, j0, di * (1 - dj)),
                              (i0 + 1, j0 + 1, di * dj)):
                if 0 <= ii < n and 0 <= jj < n and w > 0.0:
                    mat[i * n + j, ii * n + jj] += w
    return mat


@functools.lru_cache(maxsize=None)
def _multi_rotation_operator_matrix_np(ksize, orientations_nb, periodicity, disk_mask):
    """Built once per configuration; cached host-side as NUMPY only.

    Returning numpy (never a jnp array) is what prevents a traced constant
    from being cached and leaking out of a jit trace (previous failure mode).
    """
    mats = [_rotation_operator_matrix(ksize, o * periodicity / orientations_nb, disk_mask)
            for o in range(orientations_nb)]
    return np.concatenate(mats, axis=0)                   # [nOr*K*K, K*K] float32


def rotate_lifting_kernels(kernel, orientations_nb,
                           periodicity=2 * np.pi, disk_mask=True):
    """kernel: [Cout, Cin, K, K]  ->  [nOr, Cout, Cin, K, K] (as in PyTorch)."""
    cout, cin, kh, kw = kernel.shape
    kernel_flat = kernel.reshape(cout * cin, kh * kw).T            # [K*K, Cout*Cin]
    rot_np = _multi_rotation_operator_matrix_np(int(kh), int(orientations_nb),
                                                float(periodicity), bool(disk_mask))
    rot = jnp.asarray(rot_np)                                      # fresh per trace -> no leak
    rotated = rot @ kernel_flat                                    # [nOr*K*K, Cout*Cin]
    rotated = rotated.reshape(orientations_nb, kh, kw, cout, cin)
    return jnp.transpose(rotated, (0, 3, 4, 1, 2))                 # [nOr, Cout, Cin, K, K]


# ---------------------------------------------------------------------------
# Pallas hot path: weight-stationary MXU matmul per (batch, spatial tile):
#   [Otot, Kdim] @ [Kdim, ts]  ->  [Otot, ts]
# Lane axis = real spatial data (ts multiple of 128) -> unmasked, unpadded
# output stores.  bf16 operands, f32 accumulation on the MXU.
# ---------------------------------------------------------------------------
def _lifting_matmul_kernel(w_ref, p_ref, o_ref):
    # w_ref: [Otot, Kdim] bf16 (VMEM-resident, constant index_map)
    # p_ref: [1, Kdim, ts] bf16 im2col patch tile for the current batch
    # o_ref: [1, Otot, ts] f32 output tile (already in consumer layout)
    o_ref[0] = jnp.dot(w_ref[...], p_ref[0],
                       preferred_element_type=jnp.float32).astype(o_ref.dtype)


def _lifting_matmul_pallas(w_bf16, patches_bf16, ts):
    Otot, Kdim = w_bf16.shape
    B, _, Sp = patches_bf16.shape
    return pl.pallas_call(
        _lifting_matmul_kernel,
        out_shape=jax.ShapeDtypeStruct((B, Otot, Sp), jnp.float32),
        grid=(B, Sp // ts),
        in_specs=[
            pl.BlockSpec((Otot, Kdim), lambda b, s: (0, 0)),     # weight stays resident
            pl.BlockSpec((1, Kdim, ts), lambda b, s: (b, 0, s)),
        ],
        out_specs=pl.BlockSpec((1, Otot, ts), lambda b, s: (b, 0, s)),
        compiler_params=pltpu.CompilerParams(
            # Both axes independent -> megacore-shardable; >=2 steps even at toy size.
            dimension_semantics=("parallel", "parallel"),
            # Let XLA fuse the im2col producer into the patch-operand DMA so the
            # K*K-amplified patch tensor is not materialized in HBM.
            allow_input_fusion=[False, True],
        ),
    )(w_bf16, patches_bf16)


# ---------------------------------------------------------------------------
# lifting_block forward (Pallas-backed)
# ---------------------------------------------------------------------------
def lifting_block_forward(x_nchw, kernel, orientations_nb,
                          periodicity=2 * np.pi, disk_mask=True):
    B, Cin, H, W = x_nchw.shape
    Cout, _, K, _ = kernel.shape
    nOr = int(orientations_nb)
    Otot = nOr * Cout
    Kdim = K * K * Cin
    S = H * W

    # --- rotated kernel stack -> weight matrix [Otot, Kdim] (bf16) ------------
    # row o = orientation*Cout + cout ; col = (ky*K + kx)*Cin + cin
    kstack = rotate_lifting_kernels(kernel, nOr, periodicity, disk_mask)
    w2d = kstack.reshape(Otot, Cin, K, K)                            # OIHW
    w_mat = jnp.transpose(w2d, (0, 2, 3, 1)).reshape(Otot, Kdim)
    w_bf16 = w_mat.astype(jnp.bfloat16)

    # --- im2col, transposed orientation [B, Kdim, H*W] (bf16) -----------------
    # Contraction on the sublane axis (full-dim block -> no explicit zero pad),
    # real spatial data on the 128-lane axis.
    pad = K // 2   # TODO(synk): 'same' matches PyTorch only for odd K (module kSize=5)
    xb = x_nchw.astype(jnp.bfloat16)
    xp = jnp.pad(xb, ((0, 0), (0, 0), (pad, pad), (pad, pad)))       # NCHW padded
    taps = [xp[:, :, ky:ky + H, kx:kx + W] for ky in range(K) for kx in range(K)]
    patches = jnp.stack(taps, axis=1).reshape(B, Kdim, S)            # row = tap*Cin + cin

    # Spatial tile: as large as practical (sweep 2048-4096 at production sizes).
    ts = min(2048, pl.cdiv(S, 128) * 128)
    Sp = pl.cdiv(S, ts) * ts
    if Sp != S:
        patches = jnp.pad(patches, ((0, 0), (0, 0), (0, Sp - S)))

    y = _lifting_matmul_pallas(w_bf16, patches, ts)                  # [B, Otot, Sp] f32
    # Already in consumer layout: no post-kernel transpose.
    return y[:, :, :S].reshape(B, nOr, Cout, H, W)


# ---------------------------------------------------------------------------
# Pure-JAX reference (correctness check only)
# ---------------------------------------------------------------------------
def lifting_block_ref(x_nchw, kernel, orientations_nb,
                      periodicity=2 * np.pi, disk_mask=True, match_bf16=False):
    B, Cin, H, W = x_nchw.shape
    Cout, _, K, _ = kernel.shape
    kstack = rotate_lifting_kernels(kernel, orientations_nb, periodicity, disk_mask)
    w2d = kstack.reshape(orientations_nb * Cout, Cin, K, K).astype(jnp.float32)
    x = x_nchw.astype(jnp.float32)
    if match_bf16:
        # Round operands exactly like the Pallas path (bf16 inputs, f32 accumulate)
        # so the tolerance can stay tight.
        w2d = w2d.astype(jnp.bfloat16).astype(jnp.float32)
        x = x.astype(jnp.bfloat16).astype(jnp.float32)
    y = jax.lax.conv_general_dilated(
        x, w2d, window_strides=(1, 1), padding="SAME",
        dimension_numbers=("NCHW", "OIHW", "NCHW"),
        precision=jax.lax.Precision.HIGHEST)
    return y.reshape(B, orientations_nb, Cout, H, W)


if __name__ == "__main__":
    # module config: channelsIN=4, channelsOUT=4, kSize=5, orientations_nb=8
    B, Cin, H, W = 2, 4, 16, 16
    Cout, K, nOr = 4, 5, 8

    key = jax.random.PRNGKey(0)
    kkey, xkey = jax.random.split(key)
    std = math.sqrt(2.0 / (Cin * K * K))
    kernel = std * jax.random.normal(kkey, (Cout, Cin, K, K), dtype=jnp.float32)
    x = jax.random.normal(xkey, (B, Cin, H, W), dtype=jnp.float32)

    fwd = jax.jit(functools.partial(lifting_block_forward, orientations_nb=nOr))
    out = jax.block_until_ready(fwd(x, kernel))

    assert out.shape == (B, nOr, Cout, H, W), out.shape
    assert bool(jnp.all(jnp.isfinite(out)))

    # Tight check vs a reference using identically bf16-rounded operands.
    ref_bf = jax.block_until_ready(lifting_block_ref(x, kernel, nOr, match_bf16=True))
    max_err = float(jnp.max(jnp.abs(out - ref_bf)))
    assert max_err < 2e-3, f"mismatch vs bf16-matched reference conv: {max_err}"

    # Loose sanity check vs the full-precision reference (bf16 input rounding only).
    ref_f32 = jax.block_until_ready(lifting_block_ref(x, kernel, nOr, match_bf16=False))
    max_err_f32 = float(jnp.max(jnp.abs(out - ref_f32)))
    assert max_err_f32 < 0.1, f"mismatch vs f32 reference conv: {max_err_f32}"

    print("KERNEL_OK")
</pallas_src>

<mosaic_0001>
module attributes {stable_mosaic.version = 11 : i64} {
  func.func @_lifting_matmul_kernel(%arg0: i32, %arg1: i32, %arg2: memref<32x100xbf16, #tpu.memory_space<vmem>>, %arg3: memref<1x100x256xbf16, #tpu.memory_space<vmem>>, %arg4: memref<1x32x256xf32, #tpu.memory_space<vmem>>) attributes {dimension_semantics = [#tpu.dimension_semantics<parallel>, #tpu.dimension_semantics<parallel>], iteration_bounds = array<i64: 2, 1>, scalar_prefetch = 0 : i64, scratch_operands = 0 : i64, tpu.core_type = #tpu.core_type<tc>, window_params = [{pipeline_mode = #tpu.pipeline_mode<synchronous>, transform_indices = @transform_0, window_bounds = array<i64: 32, 100>}, {transform_indices = @transform_1, window_bounds = array<i64: 1, 100, 256>}, {transform_indices = @transform_2, window_bounds = array<i64: 1, 32, 256>}]} {
    %c0 = arith.constant 0 : index
    %c0_0 = arith.constant 0 : index
    %0 = vector.load %arg2[%c0, %c0_0] : memref<32x100xbf16, #tpu.memory_space<vmem>>, vector<32x100xbf16>
    %c0_1 = arith.constant 0 : index
    %c0_2 = arith.constant 0 : index
    %c0_3 = arith.constant 0 : index
    %1 = vector.load %arg3[%c0_1, %c0_2, %c0_3] : memref<1x100x256xbf16, #tpu.memory_space<vmem>>, vector<1x100x256xbf16>
    %2 = vector.shape_cast %1 : vector<1x100x256xbf16> to vector<100x256xbf16>
    %cst = arith.constant dense<0.000000e+00> : vector<32x256xf32>
    %3 = tpu.matmul %0, %2, %cst {dimension_numbers = #tpu.dot_dimension_numbers<[1], [0], [0], [1], [0, 0, 1, 1], [], []>} : vector<32x100xbf16>, vector<100x256xbf16>, vector<32x256xf32> -> vector<32x256xf32>
    %c0_4 = arith.constant 0 : index
    %c0_5 = arith.constant 0 : index
    %c0_6 = arith.constant 0 : index
    %4 = vector.load %arg4[%c0_4, %c0_5, %c0_6] : memref<1x32x256xf32, #tpu.memory_space<vmem>>, vector<1x32x256xf32>
    %5 = vector.shape_cast %4 : vector<1x32x256xf32> to vector<32x256xf32>
    %6 = vector.shape_cast %3 : vector<32x256xf32> to vector<1x32x256xf32>
    tpu.vector_store %arg4[%c0_4, %c0_5, %c0_6], %6 {strides = array<i32>} : memref<1x32x256xf32, #tpu.memory_space<vmem>>, vector<1x32x256xf32>,
    return
  }
  func.func @transform_0(%arg0: i32, %arg1: i32) -> (i32, i32) {
    %c0_i32 = arith.constant 0 : i32
    %c0_i32_0 = arith.constant 0 : i32
    %c0_i32_1 = arith.constant 0 : i32
    return %c0_i32, %c0_i32_0 : i32, i32
  }
  func.func @transform_1(%arg0: i32, %arg1: i32) -> (i32, i32, i32) {
    %c0_i32 = arith.constant 0 : i32
    %c0_i32_0 = arith.constant 0 : i32
    return %arg0, %c0_i32, %arg1 : i32, i32, i32
  }
  func.func @transform_2(%arg0: i32, %arg1: i32) -> (i32, i32, i32) {
    %c0_i32 = arith.constant 0 : i32
    %c0_i32_0 = arith.constant 0 : i32
    return %arg0, %c0_i32, %arg1 : i32, i32, i32
  }
}

</mosaic_0001>

<bundles_post_ra>
// kernel: lifting_block_forward.1
= control target key start
LH: loop header
LB: loop body
LE: loop exit
PB: predicated region body
PF: predicated region fallthrough
CT: control target
= control target key end

     0   :  { %s570_s9 = smov 0   ;;  %s572_s10 = smov 0   ;;  %s628_s0 = inlined_call_operand.vmem [shape: bf16[32,100], index: 0, kind: input, shape index: {}]   ;;  %s629_s1 = inlined_call_operand.vmem [shape: bf16[2,100,256], index: 1, kind: input, shape index: {}]   ;;  %s630_s2 = inlined_call_operand.vmem [shape: f32[2,32,256], index: 2, kind: output, shape index: {}]  }
   0x1   :  { %s574_s11 = smov 0  }
   0x2 LB: > { %s24_s12 = sadd.s32 1, %s548_s10  ;;  %p442_p0 = scmp.ge.s32.totalorder %s552_s11, 1  ;;  %s552_s11 = sphi %s574_s11, %s12_s11   ;;  %s548_s10 = sphi %s572_s10, %s632_s10   ;;  %s544_s9 = sphi %s570_s9, %s631_s9  }
   0x3   : > { %p26_p1 = scmp.ge.s32.totalorder %s24_s12, 2  ;;  %p133_p2 = scmp.lt.s32.totalorder %s552_s11, 3 }
   0x5   : > { %s634_s12 = smov (%p26_p1, %s24_s12), 0  ;;  %p134_p3 = pnand %p442_p0, %p133_p2 }
   0x6   : > { %p164_p4 = scmp.lt.s32.totalorder (!%p134_p3), %s544_s9, 1  ;;  %v554_v0 = vmov (!%p134_p3), 0   ;;  %vm283_vm0 = vcmask (!%p134_p3), 1041408   ;;  %v528_v17 = vld [vmem:[%s628_s0] sm:$0xff] (!%p134_p3)   ;;  %v529_v18 = vld [vmem:[%s628_s0 + $0x8] sm:$0xff] (!%p134_p3)   ;;  %vm276_vm1 = vcmask (!%p134_p3), 818176  }
   0x7   : > { %137 = sbr.rel (%p134_p3) target bundleno = 263 (0x107), region = 28  ;;  %322 = vmatprep.mubr.bf16.mxu0 (!%p134_p3), %v554_v0  ;;  %332 = vmatprep.mubr.bf16.mxu1 (!%p134_p3), %v554_v0 }
   0xe   : > { %s636_s9 = smov (!%p164_p4, %s544_s9), 1 }
   0xf   : > { %s482_s13 = smul.u32 104, %s636_s9  ;;  %s467_s21 = sshll.u32 %s636_s9, 6 }
  0x10   : > { %s181_s24 = scalar_lea.vmem %s630_s2, %s467_s21 }
  0x11   : > { %s594_s16 = scalar_lea.vmem %s629_s1, %s482_s13 }
  0x12   : > { %v508_v1 = vld [vmem:[%s594_s16 + $0x4] ss:$8 sps:$4 sm:$0xff]   ;;  %v510_v2 = vld [vmem:[%s594_s16] ss:$8 sps:$4 sm:$0xff]   ;;  %v511_v3 = vld [vmem:[%s594_s16 + $0x14] ss:$8 sps:$4 sm:$0xff]  }
  0x13   : > { %290 = vmatprep.subr.bf16.mxu0 %v508_v1  ;;  %468 = vmatprep.subr.bf16.mxu1 %v508_v1  ;;  %v513_v4 = vld [vmem:[%s594_s16 + $0x10] ss:$8 sps:$4 sm:$0xff]   ;;  %v514_v5 = vld [vmem:[%s594_s16 + $0x24] ss:$8 sps:$4 sm:$0xff]   ;;  %v516_v6 = vld [vmem:[%s594_s16 + $0x20] ss:$8 sps:$4 sm:$0xff]  }
  0x14   : > { %291 = vmatpush1.bf16.msra.mxu0 %v510_v2  ;;  %475 = vmatpush1.bf16.msra.mxu1 %v510_v2  ;;  %v517_v7 = vld [vmem:[%s594_s16 + $0x34] ss:$8 sps:$4 sm:$0xff]   ;;  %v519_v8 = vld [vmem:[%s594_s16 + $0x30] ss:$8 sps:$4 sm:$0xff]   ;;  %v520_v9 = vld [vmem:[%s594_s16 + $0x44] ss:$8 sps:$4 sm:$0xff]  }
  0x15   : > { %292 = vmatprep.subr.bf16.mxu0 %v511_v3  ;;  %469 = vmatprep.subr.bf16.mxu1 %v511_v3  ;;  %v522_v10 = vld [vmem:[%s594_s16 + $0x40] ss:$8 sps:$4 sm:$0xff]   ;;  %v523_v11 = vld [vmem:[%s594_s16 + $0x54] ss:$8 sps:$4 sm:$0xff]   ;;  %v525_v13 = vld [vmem:[%s594_s16 + $0x50] ss:$8 sps:$4 sm:$0xff]  }
  0x16   : > { %v200_v12 = vld [vmem:[%s594_s16 + $0x60] sm:$0x33] }
  0x17   : > { %v461_v14 = vcombine.high %v200_v12, %v200_v12  ;;  %v460_v15 = vcombine.low %v200_v12, %v200_v12 }
  0x18   : > { %293 = vmatpush1.bf16.msra.mxu0 %v513_v4  ;;  %476 = vmatpush1.bf16.msra.mxu1 %v513_v4 }
  0x19   : > { %294 = vmatprep.subr.bf16.mxu0 %v514_v5  ;;  %470 = vmatprep.subr.bf16.mxu1 %v514_v5  ;;  %v285_v16 = vsel %vm283_vm0, %v460_v15, 0 }
  0x1c   : > { %295 = vmatpush1.bf16.msra.mxu0 %v516_v6  ;;  %477 = vmatpush1.bf16.msra.mxu1 %v516_v6 }
  0x1d   : > { %296 = vmatprep.subr.bf16.mxu0 %v517_v7  ;;  %471 = vmatprep.subr.bf16.mxu1 %v517_v7 }
  0x20   : > { %297 = vmatpush1.bf16.msra.mxu0 %v519_v8  ;;  %478 = vmatpush1.bf16.msra.mxu1 %v519_v8 }
  0x21   : > { %298 = vmatprep.subr.bf16.mxu0 %v520_v9  ;;  %472 = vmatprep.subr.bf16.mxu1 %v520_v9 }
  0x24   : > { %299 = vmatpush1.bf16.msra.mxu0 %v522_v10  ;;  %479 = vmatpush1.bf16.msra.mxu1 %v522_v10 }
  0x25   : > { %300 = vmatprep.subr.bf16.mxu0 %v523_v11  ;;  %473 = vmatprep.subr.bf16.mxu1 %v523_v11 }
  0x28   : > { %301 = vmatpush1.bf16.msra.mxu0 %v525_v13  ;;  %480 = vmatpush1.bf16.msra.mxu1 %v525_v13 }
  0x29   : > { %462 = vmatprep.subr.msk.bf16.mxu0 %vm283_vm0, %v461_v14  ;;  %474 = vmatprep.subr.msk.bf16.mxu1 %vm283_vm0, %v461_v14 }
  0x2c   : > { %303 = vmatpush1.bf16.msra.mxu0 %v285_v16  ;;  %481 = vmatpush1.bf16.msra.mxu1 %v285_v16 }
  0x2f   : > { %463 = vmatmul.mubr.msk.bf16.vlgmr.msra.gmra.mrb[0].mxu0 %vm276_vm1, %v528_v17  ;;  %464 = vmatmul.mubr.msk.bf16.vlgmr.msra.gmra.mrb[0].mxu1 %vm276_vm1, %v529_v18 }
 0x102   : > { %v324_v19 = vpop.f32.mrb[0].mxu0  ;;  %v334_v20 = vpop.f32.mrb[0].mxu1 }
 0x103   : > { %343 = vst [vmem:[%s181_s24] sm:$0xff] %v324_v19  ;;  %347 = vst [vmem:[%s181_s24 + $0x20] sm:$0xff] %v334_v20  ;;  %v326_v21 = vpop.f32.mrb[1].mxu0  ;;  %v336_v22 = vpop.f32.mrb[1].mxu1 }
 0x104   : > { %344 = vst [vmem:[%s181_s24 + $0x8] sm:$0xff] %v326_v21  ;;  %348 = vst [vmem:[%s181_s24 + $0x28] sm:$0xff] %v336_v22  ;;  %v328_v23 = vpop.f32.mrb[2].mxu0  ;;  %v338_v24 = vpop.f32.mrb[2].mxu1 }
 0x105   : > { %345 = vst [vmem:[%s181_s24 + $0x10] sm:$0xff] %v328_v23  ;;  %349 = vst [vmem:[%s181_s24 + $0x30] sm:$0xff] %v338_v24  ;;  %v330_v25 = vpop.f32.mrb[3].mxu0  ;;  %v340_v26 = vpop.f32.mrb[3].mxu1 }
 0x106   : > { %346 = vst [vmem:[%s181_s24 + $0x18] sm:$0xff] %v330_v25  ;;  %350 = vst [vmem:[%s181_s24 + $0x38] sm:$0xff] %v340_v26 }
 0x107 PF: > { %s12_s11 = sadd.s32 1, %s552_s11   ;;  %s631_s9 = smov %s548_s10 }
 0x108   : > { %p9_p5 = scmp.ge.s32.totalorder %s12_s11, 4   ;;  %s632_s10 = smov %s634_s12 }
 0x10a   :  { %11 = sbr.rel (!%p9_p5) target bundleno = 2 (0x2), region = 58 }

</bundles_post_ra>
